<compile_context>
chip_gen: v7x
topology: tpu7x:2x2x1
jax: 0.10.0
libtpu: 0.0.40
codegen_flags: <defaults>
</compile_context>

<pallas_src>
import functools

import jax
import jax.numpy as jnp
from jax.experimental import pallas as pl
from jax.experimental.pallas import tpu as pltpu

_F32_BYTES = 4


def _vmem_caps():
    """Per-generation (vmem_limit_bytes, per-block working-set budget)."""
    try:
        cap = int(pltpu.get_tpu_info().vmem_capacity_bytes)  # 128 MiB v5e/v6e, 64 MiB v7x
    except Exception:
        cap = 64 << 20                                       # conservative fallback
    limit = min((cap * 3) // 4, 96 << 20)                    # scoped VMEM we request
    budget = max(8 << 20, min(limit - (8 << 20), 48 << 20))  # target working set / block
    return limit, budget


def _working_bytes_per_elem(itemsize):
    # Double-buffered pipeline windows (input + 2 outputs) ...
    pipeline = 6 * itemsize
    # ... plus in-kernel f32 working copies (x, acc, running tap, roll/select temps).
    return pipeline + 6 * _F32_BYTES


def _flat_rows_per_block(batch, n_flat, itemsize, budget):
    """Rows per block for the flat (B, L*C) layout; None -> row too big, use fallback."""
    per_row = n_flat * _working_bytes_per_elem(itemsize)
    if per_row > budget:
        return None
    rows = int(budget // per_row)
    if rows >= batch:
        if batch > 8:
            # Split into >= 2 blocks (multiples of 8) so both v7x TensorCores get work.
            return max(8, ((-(-batch // 2) + 7) // 8) * 8)
        return batch                     # full batch in one block (equals the full dim)
    rows = (rows // 8) * 8               # sublane-legal partial blocks: multiples of 8
    return rows if rows >= 8 else None


def _ctile_cols_per_block(n_chan, seq_len, itemsize, budget):
    """Channel-tile width for the (1, L, c_blk) fallback (lane-dense 128-multiples)."""
    per_col = seq_len * _working_bytes_per_elem(itemsize)
    cols = int(budget // max(per_col, 1))
    if cols >= n_chan:
        return n_chan
    # TODO(synk): tile the time axis (with a halo) if even one 128-wide channel stripe
    # exceeds the budget (pathologically long sequences).
    return min(n_chan, max(128, (cols // 128) * 128))


def _clamped_window_sum(x, *, axis, shift, pad_front, pad_end, keep_head, keep_tail):
    """Sum of the k = pad_front + 1 + pad_end replicate-padded window taps.

    Taps are built incrementally (1 XLU roll + 1 select + 1 add each): at the clamped
    edge positions the select keeps the previous value, which is exactly replicate
    padding, so no edge-value broadcasts are ever materialized.
    """
    n = x.shape[axis]
    fwd = (-shift) % n                   # brings x[.. + shift] to position ..
    bwd = shift % n
    acc = x                              # d = 0 tap
    y = x
    for _ in range(pad_end):             # taps d = +1 .. +pad_end (clamped at t = L-1)
        y = jnp.where(keep_tail, y, pltpu.roll(y, shift=fwd, axis=axis))
        acc = acc + y
    z = x
    for _ in range(pad_front):           # taps d = -1 .. -pad_front (clamped at t = 0)
        z = jnp.where(keep_head, z, pltpu.roll(z, shift=bwd, axis=axis))
        acc = acc + z
    return acc


def _decomp_flat_kernel(x_ref, res_ref, ma_ref, *, kernel_size, pad_front, pad_end,
                        seq_len, n_chan):
    # x_ref: (b_blk, L*C) -- whole flat series rows, time-major on the lane axis.
    x = x_ref[...].astype(jnp.float32)
    n_flat = x.shape[-1]
    col = jax.lax.broadcasted_iota(jnp.int32, (1, n_flat), 1)
    keep_head = col < n_chan                          # t == 0   (clamp of t-1)
    keep_tail = col >= (seq_len - 1) * n_chan         # t == L-1 (clamp of t+1)
    acc = _clamped_window_sum(x, axis=1, shift=n_chan, pad_front=pad_front,
                              pad_end=pad_end, keep_head=keep_head, keep_tail=keep_tail)
    ma = acc * (1.0 / float(kernel_size))
    ma_ref[...] = ma.astype(ma_ref.dtype)
    res_ref[...] = (x - ma).astype(res_ref.dtype)


def _decomp_ctile_kernel(x_ref, res_ref, ma_ref, *, kernel_size, pad_front, pad_end,
                         seq_len):
    # x_ref: (1, L, c_blk) -- time on the sublane axis, channel tile on lanes.
    x = x_ref[0].astype(jnp.float32)
    row = jax.lax.broadcasted_iota(jnp.int32, (seq_len, 1), 0)
    keep_head = row < 1
    keep_tail = row >= seq_len - 1
    acc = _clamped_window_sum(x, axis=0, shift=1, pad_front=pad_front,
                              pad_end=pad_end, keep_head=keep_head, keep_tail=keep_tail)
    ma = acc * (1.0 / float(kernel_size))
    ma_ref[0] = ma.astype(ma_ref.dtype)
    res_ref[0] = (x - ma).astype(res_ref.dtype)


@functools.partial(jax.jit, static_argnums=(1, 2))
def _series_decomp_impl(x, kernel_size, block_budget_bytes):
    B, L, C = x.shape
    pad_front = (kernel_size - 1) // 2
    pad_end = kernel_size // 2

    if kernel_size <= 1 or L == 1:
        ma = x                           # replicate-padded window mean degenerates to x
        return x - ma, ma

    vmem_limit, budget = _vmem_caps()
    if block_budget_bytes is not None:
        budget = int(block_budget_bytes)
    itemsize = x.dtype.itemsize

    n_flat = L * C
    b_blk = _flat_rows_per_block(B, n_flat, itemsize, budget)

    if b_blk is not None:
        # Main path: flat rows, lane-axis rolls by C. Reshapes are free (row-major).
        xf = jnp.reshape(x, (B, n_flat))
        kern = functools.partial(_decomp_flat_kernel, kernel_size=kernel_size,
                                 pad_front=pad_front, pad_end=pad_end,
                                 seq_len=L, n_chan=C)
        spec = pl.BlockSpec((b_blk, n_flat), lambda i: (i, 0))
        res_f, ma_f = pl.pallas_call(
            kern,
            out_shape=(jax.ShapeDtypeStruct((B, n_flat), x.dtype),
                       jax.ShapeDtypeStruct((B, n_flat), x.dtype)),
            grid=(pl.cdiv(B, b_blk),),
            in_specs=[spec],
            out_specs=(spec, spec),
            compiler_params=pltpu.CompilerParams(
                dimension_semantics=("parallel",),
                vmem_limit_bytes=int(vmem_limit)),
        )(xf)
        return jnp.reshape(res_f, (B, L, C)), jnp.reshape(ma_f, (B, L, C))

    # Fallback: channel-tiled blocks, time on sublanes (very large L*C rows).
    c_blk = _ctile_cols_per_block(C, L, itemsize, budget)
    kern = functools.partial(_decomp_ctile_kernel, kernel_size=kernel_size,
                             pad_front=pad_front, pad_end=pad_end, seq_len=L)
    spec = pl.BlockSpec((1, L, c_blk), lambda b, c: (b, 0, c))
    res, ma = pl.pallas_call(
        kern,
        out_shape=(jax.ShapeDtypeStruct((B, L, C), x.dtype),
                   jax.ShapeDtypeStruct((B, L, C), x.dtype)),
        grid=(B, pl.cdiv(C, c_blk)),
        in_specs=[spec],
        out_specs=(spec, spec),
        compiler_params=pltpu.CompilerParams(
            dimension_semantics=("parallel", "parallel"),
            vmem_limit_bytes=int(vmem_limit)),
    )(x)
    return res, ma


def series_decomp(x, kernel_size, *, block_budget_bytes=None):
    """Pallas SeriesDecomp. x: (B, L, C). Returns (res, moving_avg), each (B, L, C)."""
    return _series_decomp_impl(x, int(kernel_size), block_budget_bytes)


def _series_decomp_ref(x, kernel_size):
    """Pure-JAX reference matching the PyTorch module."""
    pad_front = (kernel_size - 1) // 2
    pad_end = kernel_size // 2
    front = jnp.repeat(x[:, :1, :], pad_front, axis=1)
    end = jnp.repeat(x[:, -1:, :], pad_end, axis=1)
    xp = jnp.concatenate([front, x, end], axis=1)
    L = x.shape[1]
    ma = jnp.mean(
        jnp.stack([xp[:, i:i + L, :] for i in range(kernel_size)], axis=0), axis=0)
    return x - ma, ma


if __name__ == "__main__":
    key = jax.random.PRNGKey(0)

    def _check(k, shape, kernel_size, **kw):
        x = jax.random.normal(k, shape, dtype=jnp.float32)
        res, ma = series_decomp(x, kernel_size, **kw)
        jax.block_until_ready((res, ma))
        res_ref, ma_ref = _series_decomp_ref(x, kernel_size)
        assert jnp.allclose(ma, ma_ref, atol=1e-5, rtol=1e-5), (shape, kernel_size)
        assert jnp.allclose(res, res_ref, atol=1e-5, rtol=1e-5), (shape, kernel_size)

    k0, k1, k2 = jax.random.split(key, 3)
    # Small PatchTST-style (B, L, C) demo, k=5 -- flat path, whole-batch block.
    _check(k0, (2, 128, 8), 5)
    # Autoformer k=25 with L not a multiple of 128 -- flat path, wide window.
    _check(k1, (2, 336, 8), 25)
    # Force the channel-tiled fallback (tiny budget): partial last channel block (C=160).
    _check(k2, (2, 64, 160), 7, block_budget_bytes=64 * 160 * 2)

    print("KERNEL_OK")
</pallas_src>

<mosaic_0001>
module attributes {stable_mosaic.version = 11 : i64} {
  func.func @_decomp_flat_kernel(%arg0: i32, %arg1: memref<2x1024xf32, #tpu.memory_space<vmem>>, %arg2: memref<2x1024xf32, #tpu.memory_space<vmem>>, %arg3: memref<2x1024xf32, #tpu.memory_space<vmem>>) attributes {dimension_semantics = [#tpu.dimension_semantics<parallel>], iteration_bounds = array<i64: 1>, scalar_prefetch = 0 : i64, scratch_operands = 0 : i64, tpu.core_type = #tpu.core_type<tc>, window_params = [{transform_indices = @transform_0, window_bounds = array<i64: 2, 1024>}, {transform_indices = @transform_1, window_bounds = array<i64: 2, 1024>}, {transform_indices = @transform_2, window_bounds = array<i64: 2, 1024>}]} {
    %c0 = arith.constant 0 : index
    %c0_0 = arith.constant 0 : index
    %0 = vector.load %arg1[%c0, %c0_0] : memref<2x1024xf32, #tpu.memory_space<vmem>>, vector<2x1024xf32>
    %1 = tpu.iota {dimensions = array<i32: 1>} : vector<1x1024xi32>
    %c8_i32 = arith.constant 8 : i32
    %2 = vector.broadcast %c8_i32 : i32 to vector<1x1024xi32>
    %3 = arith.cmpi slt, %1, %2 : vector<1x1024xi32>
    %c1016_i32 = arith.constant 1016 : i32
    %4 = vector.broadcast %c1016_i32 : i32 to vector<1x1024xi32>
    %5 = arith.cmpi sge, %1, %4 : vector<1x1024xi32>
    %c1016_i32_1 = arith.constant 1016 : i32
    %6 = tpu.dynamic_rotate %0 by %c1016_i32_1 dim 1 : vector<2x1024xf32>, i32 -> vector<2x1024xf32>
    %7 = vector.shape_cast %5 : vector<1x1024xi1> to vector<1x1024xi1>
    %8 = vector.broadcast %7 : vector<1x1024xi1> to vector<2x1024xi1>
    %9 = arith.select %8, %0, %6 : vector<2x1024xi1>, vector<2x1024xf32>
    %10 = arith.addf %0, %9 : vector<2x1024xf32>
    %c1016_i32_2 = arith.constant 1016 : i32
    %11 = tpu.dynamic_rotate %9 by %c1016_i32_2 dim 1 : vector<2x1024xf32>, i32 -> vector<2x1024xf32>
    %12 = vector.shape_cast %5 : vector<1x1024xi1> to vector<1x1024xi1>
    %13 = vector.broadcast %12 : vector<1x1024xi1> to vector<2x1024xi1>
    %14 = arith.select %13, %9, %11 : vector<2x1024xi1>, vector<2x1024xf32>
    %15 = arith.addf %10, %14 : vector<2x1024xf32>
    %c8_i32_3 = arith.constant 8 : i32
    %16 = tpu.dynamic_rotate %0 by %c8_i32_3 dim 1 : vector<2x1024xf32>, i32 -> vector<2x1024xf32>
    %17 = vector.shape_cast %3 : vector<1x1024xi1> to vector<1x1024xi1>
    %18 = vector.broadcast %17 : vector<1x1024xi1> to vector<2x1024xi1>
    %19 = arith.select %18, %0, %16 : vector<2x1024xi1>, vector<2x1024xf32>
    %20 = arith.addf %15, %19 : vector<2x1024xf32>
    %c8_i32_4 = arith.constant 8 : i32
    %21 = tpu.dynamic_rotate %19 by %c8_i32_4 dim 1 : vector<2x1024xf32>, i32 -> vector<2x1024xf32>
    %22 = vector.shape_cast %3 : vector<1x1024xi1> to vector<1x1024xi1>
    %23 = vector.broadcast %22 : vector<1x1024xi1> to vector<2x1024xi1>
    %24 = arith.select %23, %19, %21 : vector<2x1024xi1>, vector<2x1024xf32>
    %25 = arith.addf %20, %24 : vector<2x1024xf32>
    %cst = arith.constant 2.000000e-01 : f32
    %26 = vector.broadcast %cst : f32 to vector<2x1024xf32>
    %27 = arith.mulf %25, %26 : vector<2x1024xf32>
    %c0_5 = arith.constant 0 : index
    %c0_6 = arith.constant 0 : index
    %28 = vector.load %arg3[%c0_5, %c0_6] : memref<2x1024xf32, #tpu.memory_space<vmem>>, vector<2x1024xf32>
    tpu.vector_store %arg3[%c0_5, %c0_6], %27 {strides = array<i32>} : memref<2x1024xf32, #tpu.memory_space<vmem>>, vector<2x1024xf32>,
    %29 = arith.subf %0, %27 : vector<2x1024xf32>
    %c0_7 = arith.constant 0 : index
    %c0_8 = arith.constant 0 : index
    %30 = vector.load %arg2[%c0_7, %c0_8] : memref<2x1024xf32, #tpu.memory_space<vmem>>, vector<2x1024xf32>
    tpu.vector_store %arg2[%c0_7, %c0_8], %29 {strides = array<i32>} : memref<2x1024xf32, #tpu.memory_space<vmem>>, vector<2x1024xf32>,
    return
  }
  func.func @transform_0(%arg0: i32) -> (i32, i32) {
    %c0_i32 = arith.constant 0 : i32
    %c0_i32_0 = arith.constant 0 : i32
    return %arg0, %c0_i32 : i32, i32
  }
  func.func @transform_1(%arg0: i32) -> (i32, i32) {
    %c0_i32 = arith.constant 0 : i32
    %c0_i32_0 = arith.constant 0 : i32
    return %arg0, %c0_i32 : i32, i32
  }
  func.func @transform_2(%arg0: i32) -> (i32, i32) {
    %c0_i32 = arith.constant 0 : i32
    %c0_i32_0 = arith.constant 0 : i32
    return %arg0, %c0_i32 : i32, i32
  }
}

</mosaic_0001>

<bundles_post_ra>
// kernel: _series_decomp_impl.1
= control target key start
LH: loop header
LB: loop body
LE: loop exit
PB: predicated region body
PF: predicated region fallthrough
CT: control target
= control target key end

     0   :  { %v12_v0 = vlaneseq  ;;  %v447_v2 = vmov 1983009808   ;;  %s449_s13 = smov 8   ;;  %s663_s0 = inlined_call_operand.vmem [shape: f32[2,1024], index: 0, kind: input, shape index: {}]   ;;  %s664_s2 = inlined_call_operand.vmem [shape: f32[2,1024], index: 2, kind: output, shape index: {1}]   ;;  %s665_s1 = inlined_call_operand.vmem [shape: f32[2,1024], index: 1, kind: output, shape index: {0}]  }
   0x1   :  { %v468_v1 = vld [vmem:[%s663_s0] sm:$0xff]  ;;  %v41_v3 = vunpack.c.l.s4 %v447_v2  ;;  %v473_v4 = vld [vmem:[%s663_s0 + $0x8] sm:$0xff]  ;;  %s448_s0 = smov 120  }
   0x2   :  { %v44_v5 = vshrl.u32 %v12_v0, 7  ;;  %v39_v7 = vcombine.high %v468_v1, %v468_v1  ;;  %v56_v8 = vcombine.high %v473_v4, %v473_v4  ;;  %v513_v20 = vand.u32 127, %v12_v0 }
   0x3   :  { %v42_v6 = vunpack.c.0.s8 %v41_v3 }
   0x4   :  { %v516_v23 = vadd.s32 896, %v513_v20  ;;  %vm97_vm0 = vcmp.lt.s32.totalorder %v513_v20, 120  ;;  %vm21_vm2 = vcmp.lt.s32.totalorder %v513_v20, 8 }
   0x5   :  { %v479_v9 = vsub.s32 %v42_v6, %v44_v5 }
   0x6   :  { %vm36_vm1 = vcmp.ge.s32.totalorder %v516_v23, 1016 }
   0x7   :  { %v483_v10 = vrot.slane %v468_v1, %v479_v9  ;;  %v53_v11 = vrot.slane %v39_v7, %v479_v9  ;;  %v70_v12 = vrot.slane %v56_v8, %v479_v9  ;;  %v63_v14 = vrot.slane %v473_v4, %v479_v9 }
   0x9   :  { %81 = vrot.lane.b32.xlu0 %v483_v10, %s448_s0  ;;  %85 = vrot.lane.b32.xlu1 %v53_v11, %s448_s0  ;;  %v490_v13 = vcombine.high %v70_v12, %v70_v12  ;;  %v54_v15 = vcombine.high %v483_v10, %v483_v10  ;;  %v55_v16 = vcombine.high %v53_v11, %v53_v11 }
   0xa   :  { %v71_v17 = vcombine.high %v63_v14, %v63_v14 }
   0xd   :  { %95 = vrot.lane.b32.xlu0 %v490_v13, %s448_s0  ;;  %89 = vrot.lane.b32.xlu1 %v63_v14, %s448_s0 }
  0x11   :  { %83 = vrot.lane.b32.xlu1 %v54_v15, %s448_s0  ;;  %87 = vrot.lane.b32.xlu0 %v55_v16, %s448_s0 }
  0x15   :  { %93 = vrot.lane.b32.xlu1 %v70_v12, %s448_s0  ;;  %91 = vrot.lane.b32.xlu0 %v71_v17, %s448_s0 }
  0x19   :  { %268 = vrot.lane.b32.xlu1 %v490_v13, %s449_s13  ;;  %254 = vrot.lane.b32.xlu0 %v483_v10, %s449_s13 }
  0x1d   :  { %256 = vrot.lane.b32.xlu1 %v54_v15, %s449_s13  ;;  %266 = vrot.lane.b32.xlu0 %v70_v12, %s449_s13 }
  0x21   :  { %260 = vrot.lane.b32.xlu1 %v55_v16, %s449_s13  ;;  %258 = vrot.lane.b32.xlu0 %v53_v11, %s449_s13 }
  0x25   :  { %264 = vrot.lane.b32.xlu1 %v71_v17, %s449_s13  ;;  %262 = vrot.lane.b32.xlu0 %v63_v14, %s449_s13 }
  0x7b   :  { %v82_v18 = vpop.permute.xlu0 %81  ;;  %v86_v19 = vpop.permute.xlu1 %85 }
  0x7f   :  { %v96_v21 = vpop.permute.xlu0 %95  ;;  %v90_v22 = vpop.permute.xlu1 %89 }
  0x80   :  { %v105_v30 = vsel %vm97_vm0, %v96_v21, %v82_v18 }
  0x81   :  { %v129_v40 = vsel %vm36_vm1, %v490_v13, %v105_v30 }
  0x83   :  { %v84_v24 = vpop.permute.xlu1 %83  ;;  %v88_v25 = vpop.permute.xlu0 %87 }
  0x84   :  { %v104_v26 = vsel %vm97_vm0, %v82_v18, %v84_v24  ;;  %v102_v27 = vsel %vm97_vm0, %v86_v19, %v88_v25  ;;  %v103_v28 = vsel %vm97_vm0, %v84_v24, %v86_v19  ;;  %v101_v29 = vsel %vm97_vm0, %v88_v25, %v90_v22 }
  0x85   :  { %176 = vrot.lane.b32.xlu0 %v104_v26, %s448_s0  ;;  %180 = vrot.lane.b32.xlu1 %v102_v27, %s448_s0  ;;  %v138_v31 = vcombine.low %v104_v26, %v103_v28  ;;  %v139_v32 = vcombine.low %v102_v27, %v101_v29 }
  0x87   :  { %v94_v33 = vpop.permute.xlu1 %93  ;;  %v92_v34 = vpop.permute.xlu0 %91  ;;  %v533_v35 = vrot.slane %v138_v31, %v479_v9  ;;  %v536_v36 = vrot.slane %v139_v32, %v479_v9 }
  0x88   :  { %v100_v37 = vsel %vm97_vm0, %v90_v22, %v92_v34  ;;  %v98_v38 = vsel %vm97_vm0, %v94_v33, %v96_v21  ;;  %v99_v39 = vsel %vm97_vm0, %v92_v34, %v94_v33 }
  0x89   :  { %178 = vrot.lane.b32.xlu0 %v103_v28, %s448_s0  ;;  %184 = vrot.lane.b32.xlu1 %v100_v37, %s448_s0  ;;  %v154_v41 = vcombine.low %v533_v35, %v536_v36  ;;  %v155_v42 = vcombine.low %v100_v37, %v99_v39  ;;  %v156_v43 = vcombine.low %v98_v38, %v129_v40 }
  0x8b   :  { %v269_v44 = vpop.permute.xlu1 %268  ;;  %v255_v45 = vpop.permute.xlu0 %254  ;;  %v553_v46 = vrot.slane %v155_v42, %v479_v9  ;;  %v556_v47 = vrot.slane %v156_v43, %v479_v9  ;;  %v174_v33 = vadd.f32 %v154_v41, %v468_v1 }
  0x8c   :  { %v277_v48 = vsel %vm21_vm2, %v269_v44, %v255_v45 }
  0x8d   :  { %182 = vrot.lane.b32.xlu0 %v101_v29, %s448_s0  ;;  %188 = vrot.lane.b32.xlu1 %v98_v38, %s448_s0  ;;  %v171_v49 = vcombine.low %v553_v46, %v556_v47  ;;  %v294_v54 = vsel %vm21_vm2, %v483_v10, %v277_v48 }
  0x8f   :  { %v257_v50 = vpop.permute.xlu1 %256  ;;  %v267_v51 = vpop.permute.xlu0 %266  ;;  %v175_v23 = vadd.f32 %v171_v49, %v473_v4 }
  0x90   :  { %v270_v52 = vsel %vm21_vm2, %v267_v51, %v269_v44  ;;  %v276_v53 = vsel %vm21_vm2, %v255_v45, %v257_v50 }
  0x91   :  { %186 = vrot.lane.b32.xlu0 %v99_v39, %s448_s0  ;;  %362 = vrot.lane.b32.xlu1 %v270_v52, %s449_s13  ;;  %v310_v55 = vcombine.low %v294_v54, %v276_v53 }
  0x93   :  { %v261_v56 = vpop.permute.xlu1 %260  ;;  %v259_v57 = vpop.permute.xlu0 %258  ;;  %v318_v0 = vrot.slane %v310_v55, %v479_v9 }
  0x94   :  { %v275_v58 = vsel %vm21_vm2, %v257_v50, %v259_v57  ;;  %v274_v59 = vsel %vm21_vm2, %v259_v57, %v261_v56 }
  0x95   :  { %350 = vrot.lane.b32.xlu0 %v276_v53, %s449_s13  ;;  %352 = vrot.lane.b32.xlu1 %v275_v58, %s449_s13  ;;  %v311_v60 = vcombine.low %v275_v58, %v274_v59 }
  0x97   :  { %v265_v61 = vpop.permute.xlu1 %264  ;;  %v263_v62 = vpop.permute.xlu0 %262  ;;  %v325_v63 = vrot.slane %v311_v60, %v479_v9 }
  0x98   :  { %v273_v2 = vsel %vm21_vm2, %v261_v56, %v263_v62  ;;  %v271_v3 = vsel %vm21_vm2, %v265_v61, %v267_v51  ;;  %v272_v5 = vsel %vm21_vm2, %v263_v62, %v265_v61 }
  0x99   :  { %190 = vrot.lane.b32.xlu1 %v129_v40, %s448_s0  ;;  %354 = vrot.lane.b32.xlu0 %v274_v59, %s449_s13  ;;  %v326_v6 = vcombine.low %v318_v0, %v325_v63  ;;  %v328_v7 = vcombine.low %v271_v3, %v270_v52  ;;  %v327_v8 = vcombine.low %v273_v2, %v272_v5 }
  0x9b   :  { %v590_v11 = vrot.slane %v328_v7, %v479_v9  ;;  %v335_v12 = vrot.slane %v327_v8, %v479_v9 }
  0x9d   :  { %348 = vrot.lane.b32.xlu0 %v294_v54, %s449_s13  ;;  %356 = vrot.lane.b32.xlu1 %v273_v2, %s449_s13  ;;  %v343_v14 = vcombine.low %v335_v12, %v590_v11 }
  0xa1   :  { %360 = vrot.lane.b32.xlu1 %v271_v3, %s449_s13  ;;  %358 = vrot.lane.b32.xlu0 %v272_v5, %s449_s13 }
  0xf7   :  { %v181_v15 = vpop.permute.xlu1 %180  ;;  %v177_v16 = vpop.permute.xlu0 %176 }
  0xfb   :  { %v185_v17 = vpop.permute.xlu1 %184  ;;  %v179_v18 = vpop.permute.xlu0 %178 }
  0xfc   :  { %v197_v19 = vsel %vm97_vm0, %v179_v18, %v181_v15  ;;  %v198_v21 = vsel %vm97_vm0, %v177_v16, %v179_v18 }
  0xfd   :  { %v216_v22 = vcombine.low %v198_v21, %v197_v19 }
  0xff   :  { %v189_v24 = vpop.permute.xlu1 %188  ;;  %v183_v25 = vpop.permute.xlu0 %182  ;;  %v224_v29 = vrot.slane %v216_v22, %v479_v9 }
 0x100   :  { %v195_v26 = vsel %vm97_vm0, %v183_v25, %v185_v17  ;;  %v196_v27 = vsel %vm97_vm0, %v181_v15, %v183_v25 }
 0x101   :  { %v217_v28 = vcombine.low %v196_v27, %v195_v26 }
 0x103   :  { %v231_v30 = vrot.slane %v217_v28, %v479_v9  ;;  %v363_v31 = vpop.permute.xlu1 %362  ;;  %v187_v32 = vpop.permute.xlu0 %186 }
 0x104   :  { %v193_v38 = vsel %vm97_vm0, %v187_v32, %v189_v24  ;;  %v194_v39 = vsel %vm97_vm0, %v185_v17, %v187_v32 }
 0x105   :  { %v232_v34 = vcombine.low %v224_v29, %v231_v30  ;;  %v233_v44 = vcombine.low %v194_v39, %v193_v38 }
 0x107   :  { %v252_v35 = vadd.f32 %v232_v34, %v174_v33  ;;  %v353_v36 = vpop.permute.xlu1 %352  ;;  %v351_v37 = vpop.permute.xlu0 %350  ;;  %v241_v56 = vrot.slane %v233_v44, %v479_v9 }
 0x108   :  { %v369_v51 = vsel %vm21_vm2, %v351_v37, %v353_v36 }
 0x109   :  { %v346_v40 = vadd.f32 %v326_v6, %v252_v35 }
 0x10b   :  { %v191_v42 = vpop.permute.xlu1 %190  ;;  %v355_v43 = vpop.permute.xlu0 %354 }
 0x10c   :  { %v192_v45 = vsel %vm97_vm0, %v189_v24, %v191_v42  ;;  %v199_v41 = vsel %vm97_vm0, %v191_v42, %v177_v16  ;;  %v368_v48 = vsel %vm21_vm2, %v353_v36, %v355_v43 }
 0x10d   :  { %v207_v50 = vsel %vm36_vm1, %v490_v13, %v199_v41  ;;  %v389_v53 = vcombine.low %v369_v51, %v368_v48 }
 0x10e   :  { %v234_v52 = vcombine.low %v192_v45, %v207_v50 }
 0x10f   :  { %v357_v54 = vpop.permute.xlu1 %356  ;;  %v349_v55 = vpop.permute.xlu0 %348  ;;  %v403_v62 = vrot.slane %v389_v53, %v479_v9 }
 0x110   :  { %v248_v57 = vrot.slane %v234_v52, %v479_v9  ;;  %v370_v58 = vsel %vm21_vm2, %v349_v55, %v351_v37  ;;  %v371_v59 = vsel %vm21_vm2, %v363_v31, %v349_v55  ;;  %v367_v6 = vsel %vm21_vm2, %v355_v43, %v357_v54 }
 0x111   :  { %v372_v13 = vsel %vm21_vm2, %v483_v10, %v371_v59 }
 0x112   :  { %v249_v60 = vcombine.low %v241_v56, %v248_v57  ;;  %v388_v61 = vcombine.low %v372_v13, %v370_v58 }
 0x113   :  { %v361_v63 = vpop.permute.xlu1 %360  ;;  %v359_v0 = vpop.permute.xlu0 %358 }
 0x114   :  { %v253_v2 = vadd.f32 %v249_v60, %v175_v23  ;;  %v396_v3 = vrot.slane %v388_v61, %v479_v9  ;;  %v364_v5 = vsel %vm21_vm2, %v361_v63, %v363_v31  ;;  %v365_v10 = vsel %vm21_vm2, %v359_v0, %v361_v63 }
 0x115   :  { %v366_v46 = vsel %vm21_vm2, %v357_v54, %v359_v0  ;;  %v406_v47 = vcombine.low %v365_v10, %v364_v5 }
 0x116   :  { %v404_v49 = vcombine.low %v396_v3, %v403_v62  ;;  %v347_v7 = vadd.f32 %v343_v14, %v253_v2  ;;  %v405_v8 = vcombine.low %v367_v6, %v366_v46 }
 0x117   :  { %v420_v11 = vrot.slane %v406_v47, %v479_v9 }
 0x118   :  { %v424_v12 = vadd.f32 %v404_v49, %v346_v40  ;;  %v413_v15 = vrot.slane %v405_v8, %v479_v9 }
 0x11a   :  { %v426_v16 = vmul.f32 0.2, %v424_v12  ;;  %v421_v17 = vcombine.low %v413_v15, %v420_v11 }
 0x11c   :  { %428 = vst [vmem:[%s664_s2] sm:$0xff] %v426_v16  ;;  %v430_v18 = vsub.f32 %v468_v1, %v426_v16  ;;  %v425_v19 = vadd.f32 %v421_v17, %v347_v7 }
 0x11e   :  { %432 = vst [vmem:[%s665_s1] sm:$0xff] %v430_v18  ;;  %v427_v20 = vmul.f32 0.2, %v425_v19 }
 0x120   :  { %429 = vst [vmem:[%s664_s2 + $0x8] sm:$0xff] %v427_v20  ;;  %v431_v9 = vsub.f32 %v473_v4, %v427_v20 }
 0x122   :  { %433 = vst [vmem:[%s665_s1 + $0x8] sm:$0xff] %v431_v9 }

</bundles_post_ra>
